<compile_context>
chip_gen: v7x
topology: tpu7x:2x2x1
jax: 0.10.0
libtpu: 0.0.40
codegen_flags: <defaults>
</compile_context>

<pallas_src>
import functools

import numpy as np
import jax
import jax.numpy as jnp
from jax.experimental import pallas as pl
from jax.experimental.pallas import tpu as pltpu

LANE = 128  # TPU lane width: keep the output feature dim lane-dense.


def _round_up(x, m):
    return ((x + m - 1) // m) * m


# ---------------------------------------------------------------------------
# Stage 1: support = features @ weight   (tiny matmul, computed once, -> bf16)
# ---------------------------------------------------------------------------
def support_kernel(feat_ref, w_ref, sup_ref):
    sup_ref[...] = jnp.dot(
        feat_ref[...], w_ref[...],
        preferred_element_type=jnp.float32).astype(sup_ref.dtype)


# ---------------------------------------------------------------------------
# Stage 2: output = adjacency @ support  (bf16 adjacency stream, resident sup)
# ---------------------------------------------------------------------------
def aggregate_kernel(adj_ref, sup_ref, out_ref, *, tk):
    k = pl.program_id(1)

    # Output block index is constant across k -> out_ref is VMEM-resident and
    # serves directly as the f32 accumulator.
    @pl.when(k == 0)
    def _():
        out_ref[...] = jnp.zeros_like(out_ref)

    off = pl.multiple_of(k * tk, tk)          # aligned slice into resident support
    out_ref[...] += jnp.dot(
        adj_ref[...], sup_ref[pl.ds(off, tk), :],
        preferred_element_type=jnp.float32)


def graph_convolution(adjacency, features, weight, *, tm=1024, tk=2048):
    N, F_in = features.shape
    F_out = weight.shape[1]
    assert adjacency.shape == (N, N)
    assert weight.shape[0] == F_in

    # Lane-dense output feature dim.
    f_pad = _round_up(F_out, LANE)

    # Tile sizes: multiples of (8, 128), clamped for small graphs.
    tm = min(tm, _round_up(N, 8))
    tk = min(tk, _round_up(N, LANE))
    # v7x megacore: if a single row tile would cover the whole graph, split it
    # so the "parallel" row axis gives both TensorCores work.
    if _round_up(N, tm) // tm < 2 and N > 8:
        tm = max(8, _round_up(-(-N // 2), 8))
    n_pad_m = _round_up(N, tm)   # adjacency rows / output rows
    n_pad_k = _round_up(N, tk)   # adjacency cols / support rows

    # Fold the bf16 downcast into the (only) wrapper pass over adjacency;
    # skip the pad entirely when the tiles divide N (no hidden full copy).
    adj_p = adjacency.astype(jnp.bfloat16)
    if (n_pad_m, n_pad_k) != (N, N):
        # K-padding must be zeros so the contraction stays exact.
        adj_p = jnp.pad(adj_p, ((0, n_pad_m - N), (0, n_pad_k - N)))

    feat_p = features.astype(jnp.float32)
    if n_pad_k != N:
        feat_p = jnp.pad(feat_p, ((0, n_pad_k - N), (0, 0)))
    w_p = weight.astype(jnp.float32)
    if f_pad != F_out:
        w_p = jnp.pad(w_p, ((0, 0), (0, f_pad - F_out)))

    # ---- Stage 1: support = features @ weight (row-tiled, run once) ----
    support = pl.pallas_call(
        support_kernel,
        out_shape=jax.ShapeDtypeStruct((n_pad_k, f_pad), jnp.bfloat16),
        grid_spec=pltpu.PrefetchScalarGridSpec(
            num_scalar_prefetch=0,
            grid=(n_pad_k // tk,),
            in_specs=[
                pl.BlockSpec((tk, F_in), lambda i: (i, 0)),     # features rows
                pl.BlockSpec((F_in, f_pad), lambda i: (0, 0)),  # weight (resident)
            ],
            out_specs=pl.BlockSpec((tk, f_pad), lambda i: (i, 0)),
        ),
        compiler_params=pltpu.CompilerParams(
            dimension_semantics=("parallel",),
            vmem_limit_bytes=32 << 20),
    )(feat_p, w_p)

    # ---- Stage 2: output = adjacency @ support ----
    # grid = (row tiles [parallel], contraction tiles [arbitrary])
    out_p = pl.pallas_call(
        functools.partial(aggregate_kernel, tk=tk),
        out_shape=jax.ShapeDtypeStruct((n_pad_m, f_pad), jnp.float32),
        grid_spec=pltpu.PrefetchScalarGridSpec(
            num_scalar_prefetch=0,
            grid=(n_pad_m // tm, n_pad_k // tk),
            in_specs=[
                # adjacency stream (bf16), large tiles to amortize step overhead
                pl.BlockSpec((tm, tk), lambda i, k: (i, k)),
                # support: fully VMEM-resident, DMA'd from HBM exactly once
                pl.BlockSpec((n_pad_k, f_pad), lambda i, k: (0, 0)),
            ],
            out_specs=pl.BlockSpec((tm, f_pad), lambda i, k: (i, 0)),
        ),
        compiler_params=pltpu.CompilerParams(
            dimension_semantics=("parallel", "arbitrary"),
            # ~10-20 MiB actually used at default tiles; 48 MiB keeps headroom
            # on v7x's 64 MiB/TC and is far below v5e/v6e's 128 MiB.
            vmem_limit_bytes=48 << 20),
    )(adj_p, support)

    return out_p[:N, :F_out]


def init_weight(key, input_size, output_size):
    # Matches reset_parameters(): uniform(-stdv, stdv), stdv = 1/sqrt(output_size)
    stdv = 1.0 / np.sqrt(output_size)
    return jax.random.uniform(key, (input_size, output_size),
                              dtype=jnp.float32, minval=-stdv, maxval=stdv)


if __name__ == "__main__":
    key = jax.random.PRNGKey(0)
    k_adj, k_feat, k_w = jax.random.split(key, 3)

    # Small but non-trivial: tiles clamp to tm=320, tk=640 -> grid (2, 1),
    # no adjacency padding (tiles divide N), two parallel row tiles.
    N = 640       # number of graph nodes
    F_in = 32     # input feature size
    F_out = 16    # output feature size

    # Dense "adjacency" (torch.spmm on a dense adjacency == dense matmul).
    # TODO(synk): sparse CSR spmm path is not expressed; adjacency is streamed dense.
    adjacency = jax.random.uniform(k_adj, (N, N), dtype=jnp.float32)
    features = jax.random.normal(k_feat, (N, F_in), dtype=jnp.float32)
    weight = init_weight(k_w, F_in, F_out)

    out = graph_convolution(adjacency, features, weight)
    out = jax.block_until_ready(out)
    out_np = np.asarray(out)

    # Reference 1 (tight): same bf16 quantization of adjacency/support as the
    # kernel consumes, f32 accumulation -> only ordering / stage-1 ulp diffs.
    sup_f32 = np.asarray(features, dtype=np.float32) @ np.asarray(weight, dtype=np.float32)
    sup_q = np.asarray(jnp.asarray(sup_f32).astype(jnp.bfloat16).astype(jnp.float32))
    adj_q = np.asarray(jnp.asarray(adjacency).astype(jnp.bfloat16).astype(jnp.float32))
    ref_q = adj_q @ sup_q
    np.testing.assert_allclose(out_np, ref_q, rtol=1e-2, atol=1e-1)

    # Reference 2 (loose): exact f32 forward semantics; tolerance reflects the
    # bf16 adjacency/support stream.
    ref_f32 = np.asarray(adjacency, dtype=np.float32) @ sup_f32
    np.testing.assert_allclose(out_np, ref_f32, rtol=3e-2, atol=5e-1)

    print("KERNEL_OK")
</pallas_src>

<mosaic_0001>
module attributes {stable_mosaic.version = 11 : i64} {
  func.func @support_kernel(%arg0: i32, %arg1: memref<640x32xf32, #tpu.memory_space<vmem>>, %arg2: memref<32x128xf32, #tpu.memory_space<vmem>>, %arg3: memref<640x128xbf16, #tpu.memory_space<vmem>>) attributes {dimension_semantics = [#tpu.dimension_semantics<parallel>], iteration_bounds = array<i64: 1>, scalar_prefetch = 0 : i64, scratch_operands = 0 : i64, tpu.core_type = #tpu.core_type<tc>, window_params = [{transform_indices = @transform_0, window_bounds = array<i64: 640, 32>}, {pipeline_mode = #tpu.pipeline_mode<synchronous>, transform_indices = @transform_1, window_bounds = array<i64: 32, 128>}, {transform_indices = @transform_2, window_bounds = array<i64: 640, 128>}]} {
    %c0 = arith.constant 0 : index
    %c0_0 = arith.constant 0 : index
    %0 = vector.load %arg1[%c0, %c0_0] : memref<640x32xf32, #tpu.memory_space<vmem>>, vector<640x32xf32>
    %c0_1 = arith.constant 0 : index
    %c0_2 = arith.constant 0 : index
    %1 = vector.load %arg2[%c0_1, %c0_2] : memref<32x128xf32, #tpu.memory_space<vmem>>, vector<32x128xf32>
    %cst = arith.constant dense<0.000000e+00> : vector<640x128xf32>
    %2 = tpu.matmul %0, %1, %cst {dimension_numbers = #tpu.dot_dimension_numbers<[1], [0], [0], [1], [0, 0, 1, 1], [], []>} : vector<640x32xf32>, vector<32x128xf32>, vector<640x128xf32> -> vector<640x128xf32>
    %3 = arith.truncf %2 : vector<640x128xf32> to vector<640x128xbf16>
    %c0_3 = arith.constant 0 : index
    %c0_4 = arith.constant 0 : index
    %4 = vector.load %arg3[%c0_3, %c0_4] : memref<640x128xbf16, #tpu.memory_space<vmem>>, vector<640x128xbf16>
    tpu.vector_store %arg3[%c0_3, %c0_4], %3 {strides = array<i32>} : memref<640x128xbf16, #tpu.memory_space<vmem>>, vector<640x128xbf16>,
    return
  }
  func.func @transform_0(%arg0: i32) -> (i32, i32) {
    %c0_i32 = arith.constant 0 : i32
    %c0_i32_0 = arith.constant 0 : i32
    return %arg0, %c0_i32 : i32, i32
  }
  func.func @transform_1(%arg0: i32) -> (i32, i32) {
    %c0_i32 = arith.constant 0 : i32
    %c0_i32_0 = arith.constant 0 : i32
    %c0_i32_1 = arith.constant 0 : i32
    return %c0_i32, %c0_i32_0 : i32, i32
  }
  func.func @transform_2(%arg0: i32) -> (i32, i32) {
    %c0_i32 = arith.constant 0 : i32
    %c0_i32_0 = arith.constant 0 : i32
    return %arg0, %c0_i32 : i32, i32
  }
}

</mosaic_0001>

<bundles_post_ra>
// kernel: tpu_custom_call.1
= control target key start
LH: loop header
LB: loop body
LE: loop exit
PB: predicated region body
PF: predicated region fallthrough
CT: control target
= control target key end

     0   :  { %vm96_vm0 = vcmask 261120   ;;  %s2310_s0 = inlined_call_operand.vmem [shape: f32[640,32], index: 0, kind: input, shape index: {}]   ;;  %s2311_s1 = inlined_call_operand.vmem [shape: f32[32,128], index: 1, kind: input, shape index: {}]   ;;  %s2312_s2 = inlined_call_operand.hbm [shape: bf16[640,128], index: 2, kind: output, shape index: {}]  }
   0x1   :  { %v92_v0 = vld [vmem:[%s2311_s1] sm:$0xff]  ;;  %v93_v1 = vld [vmem:[%s2311_s1 + $0x8] sm:$0xff]  ;;  %v94_v2 = vld [vmem:[%s2311_s1 + $0x10] sm:$0xff] }
   0x2   :  { %v1909_v3 = vpack.c.bf16 %v93_v1, %v92_v0  ;;  %v95_v4 = vld [vmem:[%s2311_s1 + $0x18] sm:$0xff]  ;;  %v12_v5 = vld [vmem:[%s2310_s0] sm:$0xff]  ;;  %v13_v8 = vld [vmem:[%s2310_s0 + $0x8] sm:$0xff] }
   0x3   :  { %v52_v6 = vld [vmem:[%s2310_s0 + $0x140] sm:$0xff]  ;;  %v1913_v7 = vpack.c.bf16 %v95_v4, %v94_v2  ;;  %1789 = vmatprep.mubr.msk.f32.mxu0 %vm96_vm0, %v12_v5  ;;  %v53_v9 = vld [vmem:[%s2310_s0 + $0x148] sm:$0xff]  ;;  %v14_v10 = vld [vmem:[%s2310_s0 + $0x10] sm:$0xff] }
   0x4   :  { %1849 = vmatprep.mubr.msk.f32.mxu1 %vm96_vm0, %v52_v6  ;;  %1910 = vmatprep.subr.bf16.mxu0 %v1909_v3  ;;  %v54_v11 = vld [vmem:[%s2310_s0 + $0x150] sm:$0xff]  ;;  %v15_v12 = vld [vmem:[%s2310_s0 + $0x18] sm:$0xff]  ;;  %v16_v14 = vld [vmem:[%s2310_s0 + $0x20] sm:$0xff] }
   0x5   :  { %1917 = vmatprep.subr.bf16.mxu1 %v1909_v3  ;;  %1912 = vmatpush3.bf16.msra.mxu0 %v1909_v3  ;;  %v55_v13 = vld [vmem:[%s2310_s0 + $0x158] sm:$0xff]  ;;  %v56_v15 = vld [vmem:[%s2310_s0 + $0x160] sm:$0xff]  ;;  %v17_v16 = vld [vmem:[%s2310_s0 + $0x28] sm:$0xff] }
   0x6   :  { %1919 = vmatpush3.bf16.msra.mxu1 %v1909_v3  ;;  %1914 = vmatprep.subr.bf16.mxu0 %v1913_v7  ;;  %v57_v17 = vld [vmem:[%s2310_s0 + $0x168] sm:$0xff]  ;;  %v18_v18 = vld [vmem:[%s2310_s0 + $0x30] sm:$0xff]  ;;  %v19_v20 = vld [vmem:[%s2310_s0 + $0x38] sm:$0xff] }
   0x7   :  { %1918 = vmatprep.subr.bf16.mxu1 %v1913_v7  ;;  %v58_v19 = vld [vmem:[%s2310_s0 + $0x170] sm:$0xff]  ;;  %v59_v21 = vld [vmem:[%s2310_s0 + $0x178] sm:$0xff]  ;;  %v20_v22 = vld [vmem:[%s2310_s0 + $0x40] sm:$0xff] }
   0x8   :  { %v60_v23 = vld [vmem:[%s2310_s0 + $0x180] sm:$0xff]  ;;  %v21_v24 = vld [vmem:[%s2310_s0 + $0x48] sm:$0xff]  ;;  %v22_v26 = vld [vmem:[%s2310_s0 + $0x50] sm:$0xff] }
   0x9   :  { %1916 = vmatpush3.bf16.msra.mxu0 %v1913_v7  ;;  %v61_v25 = vld [vmem:[%s2310_s0 + $0x188] sm:$0xff]  ;;  %v62_v27 = vld [vmem:[%s2310_s0 + $0x190] sm:$0xff]  ;;  %v23_v28 = vld [vmem:[%s2310_s0 + $0x58] sm:$0xff] }
   0xa   :  { %1920 = vmatpush3.bf16.msra.mxu1 %v1913_v7  ;;  %v63_v29 = vld [vmem:[%s2310_s0 + $0x198] sm:$0xff] }
   0xc   :  { %1790 = vmatmul.mubr.msk.f32.vlgmr.msra.gmra.mrb[0].mxu0 %vm96_vm0, %v13_v8 }
   0xd   :  { %1850 = vmatmul.mubr.msk.f32.vlgmr.msra.gmra.mrb[0].mxu1 %vm96_vm0, %v53_v9  ;;  %1792 = vmatprep.mubr.msk.f32.mxu0 %vm96_vm0, %v14_v10 }
   0xe   :  { %1852 = vmatprep.mubr.msk.f32.mxu1 %vm96_vm0, %v54_v11 }
  0x10   :  { %1793 = vmatmul.mubr.msk.f32.gmra.mrb[2].mxu0 %vm96_vm0, %v15_v12 }
  0x11   :  { %1853 = vmatmul.mubr.msk.f32.gmra.mrb[2].mxu1 %vm96_vm0, %v55_v13  ;;  %1795 = vmatprep.mubr.msk.f32.mxu0 %vm96_vm0, %v16_v14 }
  0x12   :  { %1855 = vmatprep.mubr.msk.f32.mxu1 %vm96_vm0, %v56_v15 }
  0x14   :  { %1796 = vmatmul.mubr.msk.f32.gmra.mrb[4].mxu0 %vm96_vm0, %v17_v16 }
  0x15   :  { %1856 = vmatmul.mubr.msk.f32.gmra.mrb[4].mxu1 %vm96_vm0, %v57_v17  ;;  %1798 = vmatprep.mubr.msk.f32.mxu0 %vm96_vm0, %v18_v18 }
  0x16   :  { %1858 = vmatprep.mubr.msk.f32.mxu1 %vm96_vm0, %v58_v19 }
  0x18   :  { %1799 = vmatmul.mubr.msk.f32.gmra.mrb[6].mxu0 %vm96_vm0, %v19_v20 }
  0x19   :  { %1859 = vmatmul.mubr.msk.f32.gmra.mrb[6].mxu1 %vm96_vm0, %v59_v21  ;;  %1801 = vmatprep.mubr.msk.f32.mxu0 %vm96_vm0, %v20_v22 }
  0x1a   :  { %1861 = vmatprep.mubr.msk.f32.mxu1 %vm96_vm0, %v60_v23 }
  0x1c   :  { %1802 = vmatmul.mubr.msk.f32.gmra.mrb[8].mxu0 %vm96_vm0, %v21_v24 }
  0x1d   :  { %1862 = vmatmul.mubr.msk.f32.gmra.mrb[8].mxu1 %vm96_vm0, %v61_v25  ;;  %1804 = vmatprep.mubr.msk.f32.mxu0 %vm96_vm0, %v22_v26 }
  0x1e   :  { %1864 = vmatprep.mubr.msk.f32.mxu1 %vm96_vm0, %v62_v27 }
  0x1f   :  { %7 = vsyncpa [#allocation3], 0  ;;  %v24_v30 = vld [vmem:[%s2310_s0 + $0x60] sm:$0xff]  ;;  %v25_v32 = vld [vmem:[%s2310_s0 + $0x68] sm:$0xff] }
  0x20   :  { %v64_v31 = vld [vmem:[%s2310_s0 + $0x1a0] sm:$0xff]  ;;  %1805 = vmatmul.mubr.msk.f32.gmra.mrb[10].mxu0 %vm96_vm0, %v23_v28  ;;  %v65_v33 = vld [vmem:[%s2310_s0 + $0x1a8] sm:$0xff]  ;;  %v26_v34 = vld [vmem:[%s2310_s0 + $0x70] sm:$0xff] }
  0x21   :  { %1865 = vmatmul.mubr.msk.f32.gmra.mrb[10].mxu1 %vm96_vm0, %v63_v29  ;;  %1807 = vmatprep.mubr.msk.f32.mxu0 %vm96_vm0, %v24_v30  ;;  %v66_v35 = vld [vmem:[%s2310_s0 + $0x1b0] sm:$0xff]  ;;  %v27_v36 = vld [vmem:[%s2310_s0 + $0x78] sm:$0xff]  ;;  %v28_v38 = vld [vmem:[%s2310_s0 + $0x80] sm:$0xff] }
  0x22   :  { %1867 = vmatprep.mubr.msk.f32.mxu1 %vm96_vm0, %v64_v31  ;;  %v67_v37 = vld [vmem:[%s2310_s0 + $0x1b8] sm:$0xff]  ;;  %v68_v39 = vld [vmem:[%s2310_s0 + $0x1c0] sm:$0xff]  ;;  %v29_v40 = vld [vmem:[%s2310_s0 + $0x88] sm:$0xff] }
  0x23   :  { %v69_v41 = vld [vmem:[%s2310_s0 + $0x1c8] sm:$0xff]  ;;  %v30_v42 = vld [vmem:[%s2310_s0 + $0x90] sm:$0xff]  ;;  %v31_v44 = vld [vmem:[%s2310_s0 + $0x98] sm:$0xff] }
  0x24   :  { %1808 = vmatmul.mubr.msk.f32.gmra.mrb[12].mxu0 %vm96_vm0, %v25_v32  ;;  %v70_v43 = vld [vmem:[%s2310_s0 + $0x1d0] sm:$0xff]  ;;  %v71_v45 = vld [vmem:[%s2310_s0 + $0x1d8] sm:$0xff]  ;;  %v32_v46 = vld [vmem:[%s2310_s0 + $0xa0] sm:$0xff] }
  0x25   :  { %1868 = vmatmul.mubr.msk.f32.gmra.mrb[12].mxu1 %vm96_vm0, %v65_v33  ;;  %1810 = vmatprep.mubr.msk.f32.mxu0 %vm96_vm0, %v26_v34  ;;  %v72_v47 = vld [vmem:[%s2310_s0 + $0x1e0] sm:$0xff]  ;;  %v33_v48 = vld [vmem:[%s2310_s0 + $0xa8] sm:$0xff]  ;;  %v34_v50 = vld [vmem:[%s2310_s0 + $0xb0] sm:$0xff] }
  0x26   :  { %1870 = vmatprep.mubr.msk.f32.mxu1 %vm96_vm0, %v66_v35  ;;  %v73_v49 = vld [vmem:[%s2310_s0 + $0x1e8] sm:$0xff]  ;;  %v74_v51 = vld [vmem:[%s2310_s0 + $0x1f0] sm:$0xff]  ;;  %v35_v52 = vld [vmem:[%s2310_s0 + $0xb8] sm:$0xff] }
  0x27   :  { %v75_v53 = vld [vmem:[%s2310_s0 + $0x1f8] sm:$0xff]  ;;  %v36_v54 = vld [vmem:[%s2310_s0 + $0xc0] sm:$0xff]  ;;  %v37_v56 = vld [vmem:[%s2310_s0 + $0xc8] sm:$0xff] }
  0x28   :  { %1811 = vmatmul.mubr.msk.f32.gmra.mrb[14].mxu0 %vm96_vm0, %v27_v36  ;;  %v76_v55 = vld [vmem:[%s2310_s0 + $0x200] sm:$0xff]  ;;  %v77_v57 = vld [vmem:[%s2310_s0 + $0x208] sm:$0xff]  ;;  %v38_v58 = vld [vmem:[%s2310_s0 + $0xd0] sm:$0xff] }
  0x29   :  { %1871 = vmatmul.mubr.msk.f32.gmra.mrb[14].mxu1 %vm96_vm0, %v67_v37  ;;  %1813 = vmatprep.mubr.msk.f32.mxu0 %vm96_vm0, %v28_v38  ;;  %v78_v59 = vld [vmem:[%s2310_s0 + $0x210] sm:$0xff]  ;;  %v39_v60 = vld [vmem:[%s2310_s0 + $0xd8] sm:$0xff]  ;;  %v40_v62 = vld [vmem:[%s2310_s0 + $0xe0] sm:$0xff] }
  0x2a   :  { %1873 = vmatprep.mubr.msk.f32.mxu1 %vm96_vm0, %v68_v39  ;;  %v79_v61 = vld [vmem:[%s2310_s0 + $0x218] sm:$0xff]  ;;  %v80_v63 = vld [vmem:[%s2310_s0 + $0x220] sm:$0xff]  ;;  %v41_v0 = vld [vmem:[%s2310_s0 + $0xe8] sm:$0xff] }
  0x2b   :  { %v81_v1 = vld [vmem:[%s2310_s0 + $0x228] sm:$0xff]  ;;  %v42_v2 = vld [vmem:[%s2310_s0 + $0xf0] sm:$0xff]  ;;  %v43_v4 = vld [vmem:[%s2310_s0 + $0xf8] sm:$0xff] }
  0x2c   :  { %1814 = vmatmul.mubr.msk.f32.gmra.mrb[16].mxu0 %vm96_vm0, %v29_v40  ;;  %v82_v3 = vld [vmem:[%s2310_s0 + $0x230] sm:$0xff]  ;;  %v83_v5 = vld [vmem:[%s2310_s0 + $0x238] sm:$0xff]  ;;  %v44_v6 = vld [vmem:[%s2310_s0 + $0x100] sm:$0xff] }
  0x2d   :  { %1874 = vmatmul.mubr.msk.f32.gmra.mrb[16].mxu1 %vm96_vm0, %v69_v41  ;;  %1816 = vmatprep.mubr.msk.f32.mxu0 %vm96_vm0, %v30_v42  ;;  %v84_v7 = vld [vmem:[%s2310_s0 + $0x240] sm:$0xff]  ;;  %v45_v8 = vld [vmem:[%s2310_s0 + $0x108] sm:$0xff]  ;;  %v46_v10 = vld [vmem:[%s2310_s0 + $0x110] sm:$0xff] }
  0x2e   :  { %1876 = vmatprep.mubr.msk.f32.mxu1 %vm96_vm0, %v70_v43  ;;  %v85_v9 = vld [vmem:[%s2310_s0 + $0x248] sm:$0xff]  ;;  %v86_v11 = vld [vmem:[%s2310_s0 + $0x250] sm:$0xff]  ;;  %v47_v12 = vld [vmem:[%s2310_s0 + $0x118] sm:$0xff] }
  0x2f   :  { %v87_v13 = vld [vmem:[%s2310_s0 + $0x258] sm:$0xff]  ;;  %v48_v14 = vld [vmem:[%s2310_s0 + $0x120] sm:$0xff]  ;;  %v49_v16 = vld [vmem:[%s2310_s0 + $0x128] sm:$0xff] }
  0x30   :  { %1817 = vmatmul.mubr.msk.f32.gmra.mrb[18].mxu0 %vm96_vm0, %v31_v44  ;;  %v88_v15 = vld [vmem:[%s2310_s0 + $0x260] sm:$0xff]  ;;  %v89_v17 = vld [vmem:[%s2310_s0 + $0x268] sm:$0xff]  ;;  %v50_v18 = vld [vmem:[%s2310_s0 + $0x130] sm:$0xff] }
  0x31   :  { %1877 = vmatmul.mubr.msk.f32.gmra.mrb[18].mxu1 %vm96_vm0, %v71_v45  ;;  %1819 = vmatprep.mubr.msk.f32.mxu0 %vm96_vm0, %v32_v46  ;;  %v90_v19 = vld [vmem:[%s2310_s0 + $0x270] sm:$0xff]  ;;  %v51_v20 = vld [vmem:[%s2310_s0 + $0x138] sm:$0xff] }
  0x32   :  { %1879 = vmatprep.mubr.msk.f32.mxu1 %vm96_vm0, %v72_v47  ;;  %v91_v21 = vld [vmem:[%s2310_s0 + $0x278] sm:$0xff]  ;;  %s1948_s0 = smov [#allocation2]  }
  0x33   :  { %s1207_s3 = sshll.u32 %s1948_s0, 4  ;;  %s1208_s3 = int_to_ptr.vmem [resolvable:$true] %s1207_s3 }
  0x34   :  { %1820 = vmatmul.mubr.msk.f32.gmra.mrb[20].mxu0 %vm96_vm0, %v33_v48  ;;  %s1924_s4 = scalar_lea.vmem %s1208_s3, 5120  ;;  %p1929_p1 = scmp.lt.s32.totalorder %s1208_s3, %s1208_s3 }
  0x35   :  { %1880 = vmatmul.mubr.msk.f32.gmra.mrb[20].mxu1 %vm96_vm0, %v73_v49  ;;  %1822 = vmatprep.mubr.msk.f32.mxu0 %vm96_vm0, %v34_v50  ;;  %p1925_p0 = scmp.ne.s32.totalorder %s1208_s3, %s1924_s4  ;;  %p1930_p2 = scmp.lt.s32.totalorder %s1924_s4, %s1924_s4 }
  0x36   :  { %1882 = vmatprep.mubr.msk.f32.mxu1 %vm96_vm0, %v74_v51 }
  0x37   :  { %p1931_p3 = por %p1930_p2, %p1929_p1 }
  0x38   :  { %1823 = vmatmul.mubr.msk.f32.gmra.mrb[22].mxu0 %vm96_vm0, %v35_v52 }
  0x39   :  { %1883 = vmatmul.mubr.msk.f32.gmra.mrb[22].mxu1 %vm96_vm0, %v75_v53  ;;  %1825 = vmatprep.mubr.msk.f32.mxu0 %vm96_vm0, %v36_v54  ;;  %p1932_p4 = pnand %p1931_p3, %p1925_p0 }
  0x3a   :  { %1885 = vmatprep.mubr.msk.f32.mxu1 %vm96_vm0, %v76_v55 }
  0x3c   :  { %1826 = vmatmul.mubr.msk.f32.gmra.mrb[24].mxu0 %vm96_vm0, %v37_v56 }
  0x3d   :  { %1886 = vmatmul.mubr.msk.f32.gmra.mrb[24].mxu1 %vm96_vm0, %v77_v57  ;;  %1828 = vmatprep.mubr.msk.f32.mxu0 %vm96_vm0, %v38_v58 }
  0x3e   :  { %1888 = vmatprep.mubr.msk.f32.mxu1 %vm96_vm0, %v78_v59 }
  0x40   :  { %1829 = vmatmul.mubr.msk.f32.gmra.mrb[26].mxu0 %vm96_vm0, %v39_v60 }
  0x41   :  { %1889 = vmatmul.mubr.msk.f32.gmra.mrb[26].mxu1 %vm96_vm0, %v79_v61  ;;  %1831 = vmatprep.mubr.msk.f32.mxu0 %vm96_vm0, %v40_v62 }
  0x42   :  { %1891 = vmatprep.mubr.msk.f32.mxu1 %vm96_vm0, %v80_v63 }
  0x44   :  { %1832 = vmatmul.mubr.msk.f32.gmra.mrb[28].mxu0 %vm96_vm0, %v41_v0 }
  0x45   :  { %1892 = vmatmul.mubr.msk.f32.gmra.mrb[28].mxu1 %vm96_vm0, %v81_v1  ;;  %1834 = vmatprep.mubr.msk.f32.mxu0 %vm96_vm0, %v42_v2 }
  0x46   :  { %1894 = vmatprep.mubr.msk.f32.mxu1 %vm96_vm0, %v82_v3 }
  0x48   :  { %1835 = vmatmul.mubr.msk.f32.gmra.mrb[30].mxu0 %vm96_vm0, %v43_v4 }
  0x49   :  { %1895 = vmatmul.mubr.msk.f32.gmra.mrb[30].mxu1 %vm96_vm0, %v83_v5  ;;  %1837 = vmatprep.mubr.msk.f32.mxu0 %vm96_vm0, %v44_v6 }
  0x4a   :  { %1897 = vmatprep.mubr.msk.f32.mxu1 %vm96_vm0, %v84_v7 }
  0x4c   :  { %1838 = vmatmul.mubr.msk.f32.gmra.mrb[32].mxu0 %vm96_vm0, %v45_v8 }
  0x4d   :  { %1898 = vmatmul.mubr.msk.f32.gmra.mrb[32].mxu1 %vm96_vm0, %v85_v9  ;;  %1840 = vmatprep.mubr.msk.f32.mxu0 %vm96_vm0, %v46_v10 }
  0x4e   :  { %1900 = vmatprep.mubr.msk.f32.mxu1 %vm96_vm0, %v86_v11 }
  0x50   :  { %1841 = vmatmul.mubr.msk.f32.gmra.mrb[34].mxu0 %vm96_vm0, %v47_v12 }
  0x51   :  { %1901 = vmatmul.mubr.msk.f32.gmra.mrb[34].mxu1 %vm96_vm0, %v87_v13  ;;  %1843 = vmatprep.mubr.msk.f32.mxu0 %vm96_vm0, %v48_v14 }
  0x52   :  { %1903 = vmatprep.mubr.msk.f32.mxu1 %vm96_vm0, %v88_v15 }
  0x54   :  { %1844 = vmatmul.mubr.msk.f32.gmra.mrb[36].mxu0 %vm96_vm0, %v49_v16 }
  0x55   :  { %1904 = vmatmul.mubr.msk.f32.gmra.mrb[36].mxu1 %vm96_vm0, %v89_v17  ;;  %1846 = vmatprep.mubr.msk.f32.mxu0 %vm96_vm0, %v50_v18 }
  0x56   :  { %1906 = vmatprep.mubr.msk.f32.mxu1 %vm96_vm0, %v90_v19 }
  0x58   :  { %1847 = vmatmul.mubr.msk.f32.gmra.mrb[38].mxu0 %vm96_vm0, %v51_v20 }
  0x59   :  { %1907 = vmatmul.mubr.msk.f32.gmra.mrb[38].mxu1 %vm96_vm0, %v91_v21 }
  0xdf   :  { %v1791_v22 = vpop.f32.mrb[0].mxu0 }
  0xe0   :  { %v1851_v23 = vpop.f32.mrb[0].mxu1  ;;  %v403_v24 = vpop.f32.mrb[1].mxu0 }
  0xe1   :  { %v603_v25 = vpop.f32.mrb[1].mxu1  ;;  %v1461_v26 = vpack.c.bf16 %v1791_v22, %v403_v24 }
  0xe2   :  { %v1561_v27 = vpack.c.bf16 %v1851_v23, %v603_v25 }
  0xe3   :  { %1462 = vst [vmem:[#allocation2] sm:$0xff] %v1461_v26   ;;  %v1794_v28 = vpop.f32.mrb[2].mxu0 }
  0xe4   :  { %1677 = vst [vmem:[#allocation2 + $0xa0] sm:$0xff] %v1561_v27   ;;  %v1854_v29 = vpop.f32.mrb[2].mxu1  ;;  %v413_v30 = vpop.f32.mrb[3].mxu0 }
  0xe5   :  { %v613_v31 = vpop.f32.mrb[3].mxu1  ;;  %v1466_v32 = vpack.c.bf16 %v1794_v28, %v413_v30 }
  0xe6   :  { %v1566_v33 = vpack.c.bf16 %v1854_v29, %v613_v31 }
  0xe7   :  { %1658 = vst [vmem:[#allocation2 + $0x8] sm:$0xff] %v1466_v32   ;;  %v1797_v34 = vpop.f32.mrb[4].mxu0 }
  0xe8   :  { %1678 = vst [vmem:[#allocation2 + $0xa8] sm:$0xff] %v1566_v33   ;;  %v1857_v35 = vpop.f32.mrb[4].mxu1  ;;  %v423_v36 = vpop.f32.mrb[5].mxu0 }
  0xe9   :  { %v623_v37 = vpop.f32.mrb[5].mxu1  ;;  %v1471_v38 = vpack.c.bf16 %v1797_v34, %v423_v36 }
  0xea   :  { %v1571_v39 = vpack.c.bf16 %v1857_v35, %v623_v37 }
  0xeb   :  { %1659 = vst [vmem:[#allocation2 + $0x10] sm:$0xff] %v1471_v38   ;;  %v1800_v40 = vpop.f32.mrb[6].mxu0 }
  0xec   :  { %1679 = vst [vmem:[#allocation2 + $0xb0] sm:$0xff] %v1571_v39   ;;  %v1860_v41 = vpop.f32.mrb[6].mxu1  ;;  %v433_v42 = vpop.f32.mrb[7].mxu0 }
  0xed   :  { %v633_v43 = vpop.f32.mrb[7].mxu1  ;;  %v1476_v44 = vpack.c.bf16 %v1800_v40, %v433_v42 }
  0xee   :  { %v1576_v45 = vpack.c.bf16 %v1860_v41, %v633_v43 }
  0xef   :  { %1660 = vst [vmem:[#allocation2 + $0x18] sm:$0xff] %v1476_v44   ;;  %v1803_v46 = vpop.f32.mrb[8].mxu0 }
  0xf0   :  { %1680 = vst [vmem:[#allocation2 + $0xb8] sm:$0xff] %v1576_v45   ;;  %v1863_v47 = vpop.f32.mrb[8].mxu1  ;;  %v443_v48 = vpop.f32.mrb[9].mxu0 }
  0xf1   :  { %v643_v49 = vpop.f32.mrb[9].mxu1  ;;  %v1481_v50 = vpack.c.bf16 %v1803_v46, %v443_v48 }
  0xf2   :  { %v1581_v51 = vpack.c.bf16 %v1863_v47, %v643_v49 }
  0xf3   :  { %1661 = vst [vmem:[#allocation2 + $0x20] sm:$0xff] %v1481_v50   ;;  %v1806_v52 = vpop.f32.mrb[10].mxu0 }
  0xf4   :  { %1681 = vst [vmem:[#allocation2 + $0xc0] sm:$0xff] %v1581_v51   ;;  %v1866_v53 = vpop.f32.mrb[10].mxu1  ;;  %v453_v54 = vpop.f32.mrb[11].mxu0 }
  0xf5   :  { %v653_v55 = vpop.f32.mrb[11].mxu1  ;;  %v1486_v56 = vpack.c.bf16 %v1806_v52, %v453_v54 }
  0xf6   :  { %v1586_v57 = vpack.c.bf16 %v1866_v53, %v653_v55 }
  0xf7   :  { %1662 = vst [vmem:[#allocation2 + $0x28] sm:$0xff] %v1486_v56   ;;  %v1809_v58 = vpop.f32.mrb[12].mxu0 }
  0xf8   :  { %1682 = vst [vmem:[#allocation2 + $0xc8] sm:$0xff] %v1586_v57   ;;  %v1869_v59 = vpop.f32.mrb[12].mxu1  ;;  %v463_v60 = vpop.f32.mrb[13].mxu0 }
  0xf9   :  { %v663_v61 = vpop.f32.mrb[13].mxu1  ;;  %v1491_v62 = vpack.c.bf16 %v1809_v58, %v463_v60 }
  0xfa   :  { %v1591_v63 = vpack.c.bf16 %v1869_v59, %v663_v61 }
  0xfb   :  { %1663 = vst [vmem:[#allocation2 + $0x30] sm:$0xff] %v1491_v62   ;;  %v1812_v0 = vpop.f32.mrb[14].mxu0 }
  0xfc   :  { %1683 = vst [vmem:[#allocation2 + $0xd0] sm:$0xff] %v1591_v63   ;;  %v1872_v1 = vpop.f32.mrb[14].mxu1  ;;  %v473_v2 = vpop.f32.mrb[15].mxu0 }
  0xfd   :  { %v673_v3 = vpop.f32.mrb[15].mxu1  ;;  %v1496_v4 = vpack.c.bf16 %v1812_v0, %v473_v2 }
  0xfe   :  { %v1596_v5 = vpack.c.bf16 %v1872_v1, %v673_v3 }
  0xff   :  { %1664 = vst [vmem:[#allocation2 + $0x38] sm:$0xff] %v1496_v4   ;;  %v1815_v6 = vpop.f32.mrb[16].mxu0 }
 0x100   :  { %1684 = vst [vmem:[#allocation2 + $0xd8] sm:$0xff] %v1596_v5   ;;  %v1875_v7 = vpop.f32.mrb[16].mxu1  ;;  %v483_v8 = vpop.f32.mrb[17].mxu0 }
 0x101   :  { %v683_v9 = vpop.f32.mrb[17].mxu1  ;;  %v1501_v10 = vpack.c.bf16 %v1815_v6, %v483_v8 }
 0x102   :  { %v1601_v11 = vpack.c.bf16 %v1875_v7, %v683_v9 }
 0x103   :  { %1665 = vst [vmem:[#allocation2 + $0x40] sm:$0xff] %v1501_v10   ;;  %v1818_v12 = vpop.f32.mrb[18].mxu0 }
 0x104   :  { %1685 = vst [vmem:[#allocation2 + $0xe0] sm:$0xff] %v1601_v11   ;;  %v1878_v13 = vpop.f32.mrb[18].mxu1  ;;  %v493_v14 = vpop.f32.mrb[19].mxu0 }
 0x105   :  { %v693_v15 = vpop.f32.mrb[19].mxu1  ;;  %v1506_v16 = vpack.c.bf16 %v1818_v12, %v493_v14 }
 0x106   :  { %v1606_v17 = vpack.c.bf16 %v1878_v13, %v693_v15 }
 0x107   :  { %1666 = vst [vmem:[#allocation2 + $0x48] sm:$0xff] %v1506_v16   ;;  %v1821_v18 = vpop.f32.mrb[20].mxu0 }
 0x108   :  { %1686 = vst [vmem:[#allocation2 + $0xe8] sm:$0xff] %v1606_v17   ;;  %v1881_v19 = vpop.f32.mrb[20].mxu1  ;;  %v503_v20 = vpop.f32.mrb[21].mxu0 }
 0x109   :  { %v703_v21 = vpop.f32.mrb[21].mxu1  ;;  %v1511_v22 = vpack.c.bf16 %v1821_v18, %v503_v20 }
 0x10a   :  { %v1611_v23 = vpack.c.bf16 %v1881_v19, %v703_v21 }
 0x10b   :  { %1667 = vst [vmem:[#allocation2 + $0x50] sm:$0xff] %v1511_v22   ;;  %v1824_v24 = vpop.f32.mrb[22].mxu0 }
 0x10c   :  { %1687 = vst [vmem:[#allocation2 + $0xf0] sm:$0xff] %v1611_v23   ;;  %v1884_v25 = vpop.f32.mrb[22].mxu1  ;;  %v513_v26 = vpop.f32.mrb[23].mxu0 }
 0x10d   :  { %v713_v27 = vpop.f32.mrb[23].mxu1  ;;  %v1516_v28 = vpack.c.bf16 %v1824_v24, %v513_v26 }
 0x10e   :  { %v1616_v29 = vpack.c.bf16 %v1884_v25, %v713_v27 }
 0x10f   :  { %1668 = vst [vmem:[#allocation2 + $0x58] sm:$0xff] %v1516_v28   ;;  %v1827_v30 = vpop.f32.mrb[24].mxu0 }
 0x110   :  { %1688 = vst [vmem:[#allocation2 + $0xf8] sm:$0xff] %v1616_v29   ;;  %v1887_v31 = vpop.f32.mrb[24].mxu1  ;;  %v523_v32 = vpop.f32.mrb[25].mxu0 }
 0x111   :  { %v723_v33 = vpop.f32.mrb[25].mxu1  ;;  %v1521_v34 = vpack.c.bf16 %v1827_v30, %v523_v32 }
 0x112   :  { %v1621_v35 = vpack.c.bf16 %v1887_v31, %v723_v33 }
 0x113   :  { %1669 = vst [vmem:[#allocation2 + $0x60] sm:$0xff] %v1521_v34   ;;  %v1830_v36 = vpop.f32.mrb[26].mxu0 }
 0x114   :  { %1689 = vst [vmem:[#allocation2 + $0x100] sm:$0xff] %v1621_v35   ;;  %v1890_v37 = vpop.f32.mrb[26].mxu1  ;;  %v533_v38 = vpop.f32.mrb[27].mxu0 }
 0x115   :  { %v733_v39 = vpop.f32.mrb[27].mxu1  ;;  %v1526_v40 = vpack.c.bf16 %v1830_v36, %v533_v38 }
 0x116   :  { %v1626_v41 = vpack.c.bf16 %v1890_v37, %v733_v39 }
 0x117   :  { %1670 = vst [vmem:[#allocation2 + $0x68] sm:$0xff] %v1526_v40   ;;  %v1833_v42 = vpop.f32.mrb[28].mxu0 }
 0x118   :  { %1690 = vst [vmem:[#allocation2 + $0x108] sm:$0xff] %v1626_v41   ;;  %v1893_v43 = vpop.f32.mrb[28].mxu1  ;;  %v543_v44 = vpop.f32.mrb[29].mxu0 }
 0x119   :  { %v743_v45 = vpop.f32.mrb[29].mxu1  ;;  %v1531_v46 = vpack.c.bf16 %v1833_v42, %v543_v44 }
 0x11a   :  { %v1631_v47 = vpack.c.bf16 %v1893_v43, %v743_v45 }
 0x11b   :  { %1671 = vst [vmem:[#allocation2 + $0x70] sm:$0xff] %v1531_v46   ;;  %v1836_v48 = vpop.f32.mrb[30].mxu0 }
 0x11c   :  { %1691 = vst [vmem:[#allocation2 + $0x110] sm:$0xff] %v1631_v47   ;;  %v1896_v49 = vpop.f32.mrb[30].mxu1  ;;  %v553_v50 = vpop.f32.mrb[31].mxu0 }
 0x11d   :  { %v753_v51 = vpop.f32.mrb[31].mxu1  ;;  %v1536_v52 = vpack.c.bf16 %v1836_v48, %v553_v50 }
 0x11e   :  { %v1636_v53 = vpack.c.bf16 %v1896_v49, %v753_v51 }
 0x11f   :  { %1672 = vst [vmem:[#allocation2 + $0x78] sm:$0xff] %v1536_v52   ;;  %v1839_v54 = vpop.f32.mrb[32].mxu0 }
 0x120   :  { %1692 = vst [vmem:[#allocation2 + $0x118] sm:$0xff] %v1636_v53   ;;  %v1899_v55 = vpop.f32.mrb[32].mxu1  ;;  %v563_v56 = vpop.f32.mrb[33].mxu0 }
 0x121   :  { %v763_v57 = vpop.f32.mrb[33].mxu1  ;;  %v1541_v58 = vpack.c.bf16 %v1839_v54, %v563_v56 }
 0x122   :  { %v1641_v59 = vpack.c.bf16 %v1899_v55, %v763_v57 }
 0x123   :  { %1673 = vst [vmem:[#allocation2 + $0x80] sm:$0xff] %v1541_v58   ;;  %v1842_v60 = vpop.f32.mrb[34].mxu0 }
 0x124   :  { %1693 = vst [vmem:[#allocation2 + $0x120] sm:$0xff] %v1641_v59   ;;  %v1902_v61 = vpop.f32.mrb[34].mxu1  ;;  %v573_v62 = vpop.f32.mrb[35].mxu0 }
 0x125   :  { %v773_v63 = vpop.f32.mrb[35].mxu1  ;;  %v1546_v0 = vpack.c.bf16 %v1842_v60, %v573_v62 }
 0x126   :  { %v1646_v1 = vpack.c.bf16 %v1902_v61, %v773_v63 }
 0x127   :  { %1674 = vst [vmem:[#allocation2 + $0x88] sm:$0xff] %v1546_v0   ;;  %v1845_v2 = vpop.f32.mrb[36].mxu0 }
 0x128   :  { %1694 = vst [vmem:[#allocation2 + $0x128] sm:$0xff] %v1646_v1   ;;  %v1905_v3 = vpop.f32.mrb[36].mxu1  ;;  %v583_v4 = vpop.f32.mrb[37].mxu0 }
 0x129   :  { %v783_v5 = vpop.f32.mrb[37].mxu1  ;;  %v1551_v6 = vpack.c.bf16 %v1845_v2, %v583_v4 }
 0x12a   :  { %v1651_v7 = vpack.c.bf16 %v1905_v3, %v783_v5 }
 0x12b   :  { %1675 = vst [vmem:[#allocation2 + $0x90] sm:$0xff] %v1551_v6   ;;  %v1848_v8 = vpop.f32.mrb[38].mxu0 }
 0x12c   :  { %1695 = vst [vmem:[#allocation2 + $0x130] sm:$0xff] %v1651_v7   ;;  %v1908_v9 = vpop.f32.mrb[38].mxu1  ;;  %v593_v10 = vpop.f32.mrb[39].mxu0 }
 0x12d   :  { %v793_v11 = vpop.f32.mrb[39].mxu1  ;;  %v1556_v12 = vpack.c.bf16 %v1848_v8, %v593_v10 }
 0x12e   :  { %v1656_v13 = vpack.c.bf16 %v1908_v9, %v793_v11 }
 0x12f   :  { %1676 = vst [vmem:[#allocation2 + $0x98] sm:$0xff] %v1556_v12  }
 0x130   :  { %1696 = vst [vmem:[#allocation2 + $0x138] sm:$0xff] %v1656_v13  }
 0x131   :  { %1935 = shalt.err (!%p1932_p4)
}
 0x132   :  { %s1936_s7 = scalar_lea.hbm %s2312_s2, 5120 }
 0x133   :  { %p1937_p5 = scmp.ne.s32.totalorder %s2312_s2, %s1936_s7  ;;  %p1940_p6 = scmp.lt.u32.totalorder %s1936_s7, %s2312_s2 }
 0x135   :  { %p1942_p7 = pnand %p1940_p6, %p1937_p5 }
 0x137   :  { %1945 = shalt.err (!%p1942_p7)
}
 0x138   :  { %s1949_s12 = smov 64   ;;  %s1950_s13 = smov 4  }
 0x139   :  { %1213 = dma.vmem_to_hbm [thread:$0]  %s1208_s3, 5120, %s2312_s2, [#allocation3], %s1949_s12, %s1949_s12, %s1950_s13  }
 0x13a   :  { %1946 = dma.done.wait [#allocation3], 5120  }
 0x13b   :  { %1947 = vsyncadd [#allocation3], 4294962176 }
 0x13c   :  { %1217 = vsyncpa [#allocation3], 1 }

</bundles_post_ra>
